<compile_context>
chip_gen: v7x
topology: tpu7x:2x2x1
jax: 0.10.0
libtpu: 0.0.40
codegen_flags: <defaults>
</compile_context>

<pallas_src>
import jax
import jax.numpy as jnp
from jax.experimental import pallas as pl
from jax.experimental.pallas import tpu as pltpu

C_OUT = 4
KSIZE = 5
PAD = 2
H = 56
W = 56
HP = 64      # sublane-padded rows (>= H + 2*PAD, multiple of 8)
LANES = 128  # lane-padded width so every hot-loop operand/store is a full vreg row


def _probe_roll_sign() -> int:
    """Detect pltpu.roll convention: +1 means jnp.roll semantics (out[j] = x[j - shift])."""
    def _k(x_ref, o_ref):
        o_ref[...] = pltpu.roll(x_ref[...], shift=1, axis=1)

    x = jnp.broadcast_to(jax.lax.iota(jnp.float32, LANES)[None, :], (8, LANES))
    y = pl.pallas_call(
        _k, out_shape=jax.ShapeDtypeStruct((8, LANES), jnp.float32)
    )(x)
    val = float(jax.device_get(y)[0, 1])
    if val == 0.0:      # element 0 moved to index 1 -> jnp.roll convention
        return 1
    if val == 2.0:      # element 2 moved to index 1 -> opposite convention
        return -1
    return 1            # default to jnp.roll convention


_ROLL_SIGN = _probe_roll_sign()


def conv_add_kernel(x1p_ref, x2_ref, x3_ref, w_ref, b_ref, v2_ref, v3_ref):
    """Fused 5x5 conv (1 -> 4 ch, padding=2) + the two residual adds.

    x1p_ref: VMEM (HP, LANES) f32  -- zero-padded plane: x1 at rows [PAD,PAD+H), lanes [0,W)
    x2_ref:  VMEM (H, LANES)  f32  -- lane-padded x2
    x3_ref:  VMEM (H, LANES)  f32  -- lane-padded x3
    w_ref:   SMEM (C_OUT*K*K,) f32 -- OIHW-flattened conv weights
    b_ref:   SMEM (C_OUT,)     f32 -- conv bias
    v2_ref:  VMEM (C_OUT, H, LANES) f32   (lanes >= W are junk; wrapper slices them off)
    v3_ref:  VMEM (C_OUT, H, LANES) f32
    """
    # 4 independent per-channel accumulator chains, initialized to bias.
    accs = [jnp.full((H, LANES), b_ref[co], dtype=jnp.float32) for co in range(C_OUT)]

    for ki in range(KSIZE):
        # One sublane-offset read per kernel row (rows ki..ki+H-1 of the padded plane).
        rows = x1p_ref[ki:ki + H, :]                       # (H, LANES)
        for kj in range(KSIZE):
            delta = kj - PAD                               # tap[:, j] = rows[:, j + delta]
            if delta == 0:
                tap = rows
            else:
                # Lane rotate on the XLU slot; wrap-around lanes land in the zero pad
                # (lanes >= W of the plane are zero), so zero-padding is preserved for j < W.
                shift = (_ROLL_SIGN * (-delta)) % LANES
                tap = pltpu.roll(rows, shift=shift, axis=1)
            for co in range(C_OUT):
                wv = w_ref[co * KSIZE * KSIZE + ki * KSIZE + kj]
                accs[co] = accs[co] + tap * wv

    # Epilogue: residual adds + full-lane (unmasked) stores.
    x2 = x2_ref[...]
    x3 = x3_ref[...]
    for co in range(C_OUT):
        a = accs[co]
        v2_ref[co, :, :] = a + x2
        v3_ref[co, :, :] = a + x3


def model_forward(x1, x2, x3, weight, bias):
    """x1, x2, x3: (1, 1, H, W) f32 (NCHW). Returns (v2, v3), each (1, C_OUT, H, W)."""
    # Layout plumbing (essentially free in XLA): zero-pad x1 into the (HP, LANES) plane,
    # lane-pad x2/x3 to full vreg width.
    x1_plane = jnp.pad(x1[0, 0].astype(jnp.float32),
                       ((PAD, HP - H - PAD), (0, LANES - W)))
    x2_p = jnp.pad(x2[0, 0].astype(jnp.float32), ((0, 0), (0, LANES - W)))
    x3_p = jnp.pad(x3[0, 0].astype(jnp.float32), ((0, 0), (0, LANES - W)))
    w_flat = weight.reshape(-1).astype(jnp.float32)        # (C_OUT*K*K,), OIHW order
    b_flat = bias.astype(jnp.float32)                      # (C_OUT,)

    v2f, v3f = pl.pallas_call(
        conv_add_kernel,
        out_shape=(
            jax.ShapeDtypeStruct((C_OUT, H, LANES), jnp.float32),
            jax.ShapeDtypeStruct((C_OUT, H, LANES), jnp.float32),
        ),
        in_specs=[
            pl.BlockSpec(memory_space=pltpu.MemorySpace.VMEM),  # x1 padded plane
            pl.BlockSpec(memory_space=pltpu.MemorySpace.VMEM),  # x2 (lane-padded)
            pl.BlockSpec(memory_space=pltpu.MemorySpace.VMEM),  # x3 (lane-padded)
            pl.BlockSpec(memory_space=pltpu.MemorySpace.SMEM),  # weights
            pl.BlockSpec(memory_space=pltpu.MemorySpace.SMEM),  # bias
        ],
        out_specs=(
            pl.BlockSpec(memory_space=pltpu.MemorySpace.VMEM),
            pl.BlockSpec(memory_space=pltpu.MemorySpace.VMEM),
        ),
    )(x1_plane, x2_p, x3_p, w_flat, b_flat)

    # Drop the junk lanes >= W and restore NCHW.
    return v2f[None, :, :, :W], v3f[None, :, :, :W]


def _reference(x1, x2, x3, weight, bias):
    """Pure-JAX reference (NCHW conv) for correctness checking."""
    v1 = jax.lax.conv_general_dilated(
        x1, weight,
        window_strides=(1, 1),
        padding=((PAD, PAD), (PAD, PAD)),
        dimension_numbers=("NCHW", "OIHW", "NCHW"),
    ) + bias.reshape(1, C_OUT, 1, 1)
    return v1 + x2, v1 + x3


if __name__ == "__main__":
    key = jax.random.PRNGKey(0)
    k1, k2, k3, kw, kb = jax.random.split(key, 5)

    x1 = jax.random.normal(k1, (1, 1, H, W), dtype=jnp.float32)
    x2 = jax.random.normal(k2, (1, 1, H, W), dtype=jnp.float32)
    x3 = jax.random.normal(k3, (1, 1, H, W), dtype=jnp.float32)

    # deterministic Conv2d(1, 4, 5) params (PyTorch-style uniform init bound)
    fan_in = 1 * KSIZE * KSIZE
    bound = 1.0 / (fan_in ** 0.5)
    weight = jax.random.uniform(kw, (C_OUT, 1, KSIZE, KSIZE),
                                minval=-bound, maxval=bound, dtype=jnp.float32)
    bias = jax.random.uniform(kb, (C_OUT,), minval=-bound, maxval=bound,
                              dtype=jnp.float32)

    v2, v3 = jax.jit(model_forward)(x1, x2, x3, weight, bias)
    jax.block_until_ready((v2, v3))

    r2, r3 = _reference(x1, x2, x3, weight, bias)
    assert v2.shape == (1, C_OUT, H, W) and v3.shape == (1, C_OUT, H, W)
    assert jnp.allclose(v2, r2, atol=1e-4, rtol=1e-4)
    assert jnp.allclose(v3, r3, atol=1e-4, rtol=1e-4)

    print("KERNEL_OK")
</pallas_src>

<mosaic_0001>
module attributes {stable_mosaic.version = 11 : i64} {
  func.func @_k(%arg0: memref<8x128xf32, #tpu.memory_space<vmem>>, %arg1: memref<8x128xf32, #tpu.memory_space<vmem>>) attributes {dimension_semantics = [], scalar_prefetch = 0 : i64, scratch_operands = 0 : i64, tpu.core_type = #tpu.core_type<tc>} {
    %c0 = arith.constant 0 : index
    %c0_0 = arith.constant 0 : index
    %0 = vector.load %arg0[%c0, %c0_0] : memref<8x128xf32, #tpu.memory_space<vmem>>, vector<8x128xf32>
    %c1_i32 = arith.constant 1 : i32
    %1 = tpu.dynamic_rotate %0 by %c1_i32 dim 1 : vector<8x128xf32>, i32 -> vector<8x128xf32>
    %c0_1 = arith.constant 0 : index
    %c0_2 = arith.constant 0 : index
    %2 = vector.load %arg1[%c0_1, %c0_2] : memref<8x128xf32, #tpu.memory_space<vmem>>, vector<8x128xf32>
    tpu.vector_store %arg1[%c0_1, %c0_2], %1 {strides = array<i32>} : memref<8x128xf32, #tpu.memory_space<vmem>>, vector<8x128xf32>,
    return
  }
}

</mosaic_0001>

<bundles_post_ra>
// kernel: tpu_custom_call.1
= control target key start
LH: loop header
LB: loop body
LE: loop exit
PB: predicated region body
PF: predicated region fallthrough
CT: control target
= control target key end

     0   :  { %6 = vsyncpa [#allocation3], 0  ;;  %s128_s0 = inlined_call_operand.hbm [shape: f32[8,128], index: 0, kind: input, shape index: {}]   ;;  %s129_s1 = inlined_call_operand.hbm [shape: f32[8,128], index: 1, kind: output, shape index: {}]  }
   0x1   :  { %7 = vsyncpa [#allocation4], 0  ;;  %s91_s6 = smov [#allocation2]   ;;  %s43_s10 = scalar_lea.hbm %s128_s0, 128 }
   0x2   :  { %s14_s7 = sshll.u32 %s91_s6, 4  ;;  %p44_p0 = scmp.ne.s32.totalorder %s128_s0, %s43_s10  ;;  %s15_s7 = int_to_ptr.vmem [resolvable:$true] %s14_s7 }
   0x3   :  { %p47_p1 = scmp.lt.u32.totalorder %s43_s10, %s128_s0 }
   0x5   :  { %p49_p2 = pnand %p47_p1, %p44_p0 }
   0x7   :  { %52 = shalt.err (!%p49_p2)
}
   0x8   :  { %s53_s15 = scalar_lea.vmem %s15_s7, 128  ;;  %p58_p4 = scmp.lt.s32.totalorder %s15_s7, %s15_s7 }
   0x9   :  { %p54_p3 = scmp.ne.s32.totalorder %s15_s7, %s53_s15  ;;  %p59_p5 = scmp.lt.s32.totalorder %s53_s15, %s53_s15 }
   0xb   :  { %p60_p6 = por %p59_p5, %p58_p4 }
   0xd   :  { %p61_p7 = pnand %p60_p6, %p54_p3 }
   0xf   :  { %64 = shalt.err (!%p61_p7)
}
  0x10   :  { %17 = dma.hbm_to_vmem [thread:$0]  %s128_s0, 128, %s15_s7, [#allocation3]  }
  0x11   :  { %87 = dma.done.wait [#allocation3], 128  }
  0x12   :  { %88 = vsyncadd [#allocation3], 4294967168  ;;  %v21_v0 = vld [vmem:[#allocation2] sm:$0xff]  ;;  %s92_s18 = smov 1   ;;  %s93_s19 = smov [#allocation5]  }
  0x13   :  { %22 = vrot.lane.b32.xlu0 %v21_v0, %s92_s18  ;;  %s31_s20 = sshll.u32 %s93_s19, 4  ;;  %s32_s20 = int_to_ptr.vmem [resolvable:$true] %s31_s20 }
  0x14   :  { %s65_s21 = scalar_lea.vmem %s32_s20, 128  ;;  %p70_p9 = scmp.lt.s32.totalorder %s32_s20, %s32_s20 }
  0x15   :  { %p66_p8 = scmp.ne.s32.totalorder %s32_s20, %s65_s21  ;;  %p71_p10 = scmp.lt.s32.totalorder %s65_s21, %s65_s21 }
  0x17   :  { %p72_p11 = por %p71_p10, %p70_p9 }
  0x19   :  { %p73_p12 = pnand %p72_p11, %p66_p8 }
  0x85   :  { %v23_v1 = vpop.permute.xlu0 %22 }
  0x86   :  { %24 = vst [vmem:[#allocation5] sm:$0xff] %v23_v1 }
  0x87   :  { %76 = shalt.err (!%p73_p12)
}
  0x88   :  { %s77_s0 = scalar_lea.hbm %s129_s1, 128 }
  0x89   :  { %p78_p13 = scmp.ne.s32.totalorder %s129_s1, %s77_s0  ;;  %p81_p0 = scmp.lt.u32.totalorder %s77_s0, %s129_s1 }
  0x8b   :  { %p83_p1 = pnand %p81_p0, %p78_p13 }
  0x8d   :  { %86 = shalt.err (!%p83_p1)
}
  0x8e   :  { %34 = dma.vmem_to_hbm [thread:$0]  %s32_s20, 128, %s129_s1, [#allocation4]  }
  0x8f   :  { %89 = dma.done.wait [#allocation4], 128  }
  0x90   :  { %90 = vsyncadd [#allocation4], 4294967168 }
  0x91   :  { %38 = vsyncpa [#allocation3], 1 }
  0x92   :  { %39 = vsyncpa [#allocation4], 1 }

</bundles_post_ra>
